<compile_context>
chip_gen: v7x
topology: tpu7x:2x2x1
jax: 0.10.0
libtpu: 0.0.40
codegen_flags: <defaults>
</compile_context>

<pallas_src>
import jax
import jax.numpy as jnp
from jax import lax
from jax.experimental import pallas as pl
from jax.experimental.pallas import tpu as pltpu


def _round_up(x, m):
    return (x + m - 1) // m * m


def _tpu_vmem_capacity_bytes():
    """Physical VMEM bytes (64 MiB on v7x, 128 MiB on v5e/v6e); safe default."""
    try:
        info = pltpu.get_tpu_info()
        cap = getattr(info, "vmem_capacity_bytes", None)
        if cap:
            return int(cap)
    except Exception:
        pass
    return 64 * 1024 * 1024  # conservative (v7x per-core VMEM)


def _choose_tile_b(B):
    if B <= 128:
        return _round_up(B, 8)
    # Lane-dense tiles (multiple of 128); keep >= 2 tiles so the "parallel"
    # grid axis actually splits work across v7x's two TensorCores.
    b128 = _round_up(B, 128)
    return min(512, max(128, (b128 // 2 // 128) * 128))


# --------------------------------------------------------------------------
# Path A: embedding tables resident in VMEM; in-kernel gather (no HBM DMAs).
# --------------------------------------------------------------------------
def _kernel_vmem_tables(uid_ref, mid_ref,      # scalar-prefetch ids (SMEM)
                        u_ref, m_ref,          # full tables, VMEM-resident
                        w_ref, b_ref,          # Linear(1,1) params (SMEM)
                        o_ref,                 # (1, 1, TB) output block (VMEM)
                        ubuf, mbuf):           # (TB, D) VMEM gather scratch
    TB, _ = ubuf.shape
    base = pl.program_id(0) * TB
    w = w_ref[0]
    b = b_ref[0]

    def gather(r, carry):
        uid = uid_ref[base + r]
        mid = mid_ref[base + r]
        ubuf[pl.ds(r, 1), :] = u_ref[pl.ds(uid, 1), :]
        mbuf[pl.ds(r, 1), :] = m_ref[pl.ds(mid, 1), :]
        return carry

    lax.fori_loop(0, TB, gather, 0, unroll=8)

    m_u = jnp.sum(ubuf[...] * mbuf[...], axis=1)            # (TB,) f32
    o_ref[...] = jax.nn.sigmoid(m_u * w + b).reshape(1, 1, TB)


# --------------------------------------------------------------------------
# Path B: tables stay in HBM; per-row DMA gather with counting semaphores.
# --------------------------------------------------------------------------
def _kernel_hbm_tables(uid_ref, mid_ref,       # scalar-prefetch ids (SMEM)
                       u_hbm, m_hbm,           # embedding tables (HBM / ANY)
                       w_ref, b_ref,           # Linear(1,1) params (SMEM)
                       o_ref,                  # (1, 1, TB) output block (VMEM)
                       ubuf, mbuf, sems):      # (TB, D) scratch + 2 DMA sems
    TB, _ = ubuf.shape
    base = pl.program_id(0) * TB
    # Hoist SMEM scalar reads above the DMA waits (waits break sst->sld fwd).
    w = w_ref[0]
    b = b_ref[0]

    # Issue all row gathers for this tile; one counting semaphore per table.
    def issue(r, carry):
        uid = uid_ref[base + r]
        mid = mid_ref[base + r]
        pltpu.make_async_copy(u_hbm.at[uid], ubuf.at[r], sems.at[0]).start()
        pltpu.make_async_copy(m_hbm.at[mid], mbuf.at[r], sems.at[1]).start()
        return carry

    lax.fori_loop(0, TB, issue, 0, unroll=8)

    # Drain: per-row-sized decrements on the shared semaphores.  Descriptor
    # shape only sets the wait amount; use the matching source table.
    def drain(r, carry):
        pltpu.make_async_copy(u_hbm.at[0], ubuf.at[r], sems.at[0]).wait()
        pltpu.make_async_copy(m_hbm.at[0], mbuf.at[r], sems.at[1]).wait()
        return carry

    lax.fori_loop(0, TB, drain, 0, unroll=8)

    m_u = jnp.sum(ubuf[...] * mbuf[...], axis=1)             # (TB,) f32
    o_ref[...] = jax.nn.sigmoid(m_u * w + b).reshape(1, 1, TB)


def user_movie_embedding_forward(x, u_table, m_table, fc_w, fc_b, *,
                                 force_hbm_tables=False):
    """x: (B, 2) int ids; u_table: (Lu, D) f32; m_table: (Lm, D) f32;
    fc_w, fc_b: (1,) f32 (Linear(1,1)). Returns (B, 1) f32."""
    B = x.shape[0]
    Lu, D = u_table.shape
    Lm = m_table.shape[0]

    TB = _choose_tile_b(B)
    B_pad = _round_up(B, TB)
    num_tiles = B_pad // TB

    user_ids = x[:, 0].astype(jnp.int32)
    movie_ids = x[:, 1].astype(jnp.int32)
    if B_pad != B:
        pad = B_pad - B
        user_ids = jnp.pad(user_ids, (0, pad))     # id 0 is always a valid row
        movie_ids = jnp.pad(movie_ids, (0, pad))

    u_table = jnp.asarray(u_table, jnp.float32)
    m_table = jnp.asarray(m_table, jnp.float32)
    fc_w = jnp.asarray(fc_w, jnp.float32).reshape(-1)
    fc_b = jnp.asarray(fc_b, jnp.float32).reshape(-1)

    # ---- generation-aware table placement decision -------------------------
    vmem_phys = _tpu_vmem_capacity_bytes()               # 64 MiB v7x, 128 MiB v5e/v6e
    table_bytes = (Lu + Lm) * D * 4
    scratch_bytes = 2 * TB * D * 4
    # Count tables twice: Pallas may double-buffer blocked inputs; keep
    # headroom for output blocks + compiler internal scratch.
    table_budget = vmem_phys - 28 * 1024 * 1024
    use_vmem_tables = (not force_hbm_tables) and \
                      (2 * table_bytes + scratch_bytes <= table_budget)

    if use_vmem_tables:
        kernel = _kernel_vmem_tables
        in_specs = [
            pl.BlockSpec((Lu, D), lambda t, uids, mids: (0, 0)),   # u_table resident
            pl.BlockSpec((Lm, D), lambda t, uids, mids: (0, 0)),   # m_table resident
            pl.BlockSpec(memory_space=pltpu.MemorySpace.SMEM),     # fc_w
            pl.BlockSpec(memory_space=pltpu.MemorySpace.SMEM),     # fc_b
        ]
        scratch_shapes = [
            pltpu.VMEM((TB, D), jnp.float32),
            pltpu.VMEM((TB, D), jnp.float32),
        ]
        vmem_limit = int(min(vmem_phys - 8 * 1024 * 1024,
                             max(32 * 1024 * 1024,
                                 2 * table_bytes + scratch_bytes + 8 * 1024 * 1024)))
        bytes_accessed = table_bytes + 2 * B_pad * 4 + B_pad * 4
    else:
        kernel = _kernel_hbm_tables
        in_specs = [
            pl.BlockSpec(memory_space=pl.ANY),                     # u_table in HBM
            pl.BlockSpec(memory_space=pl.ANY),                     # m_table in HBM
            pl.BlockSpec(memory_space=pltpu.MemorySpace.SMEM),     # fc_w
            pl.BlockSpec(memory_space=pltpu.MemorySpace.SMEM),     # fc_b
        ]
        scratch_shapes = [
            pltpu.VMEM((TB, D), jnp.float32),
            pltpu.VMEM((TB, D), jnp.float32),
            pltpu.SemaphoreType.DMA((2,)),          # one counting sem per table
        ]
        vmem_limit = 32 * 1024 * 1024
        bytes_accessed = 2 * B_pad * D * 4 + 2 * B_pad * 4 + B_pad * 4

    grid_spec = pltpu.PrefetchScalarGridSpec(
        num_scalar_prefetch=2,
        grid=(num_tiles,),
        in_specs=in_specs,
        out_specs=pl.BlockSpec((1, 1, TB), lambda t, uids, mids: (t, 0, 0)),
        scratch_shapes=scratch_shapes,
    )

    out = pl.pallas_call(
        kernel,
        out_shape=jax.ShapeDtypeStruct((num_tiles, 1, TB), jnp.float32),
        grid_spec=grid_spec,
        compiler_params=pltpu.CompilerParams(
            dimension_semantics=("parallel",),       # megacore split on v7x
            vmem_limit_bytes=vmem_limit,
        ),
        cost_estimate=pl.CostEstimate(
            flops=2 * B_pad * D + 3 * B_pad,
            transcendentals=B_pad,
            bytes_accessed=int(bytes_accessed),
        ),
    )(user_ids, movie_ids, u_table, m_table, fc_w, fc_b)

    # Lane-dense (num_tiles, 1, TB) slab -> (B, 1), dropping padded rows.
    return out.reshape(B_pad, 1)[:B]


def _reference(x, u_table, m_table, fc_w, fc_b):
    uemb = u_table[x[:, 0]]
    memb = m_table[x[:, 1]]
    m_u = jnp.sum(uemb * memb, axis=1, keepdims=True)
    return jax.nn.sigmoid(m_u * fc_w.reshape(-1)[0] + fc_b.reshape(-1)[0])


if __name__ == "__main__":
    # Small, deterministic setup consistent with the module's __init__.
    len_users, len_movies, embedding_dim = 64, 48, 32
    batch = 8

    key = jax.random.PRNGKey(0)
    k_u, k_m, k_w, k_b, k_uid, k_mid = jax.random.split(key, 6)

    # nn.Embedding default init: N(0, 1)
    u_table = jax.random.normal(k_u, (len_users, embedding_dim), dtype=jnp.float32)
    m_table = jax.random.normal(k_m, (len_movies, embedding_dim), dtype=jnp.float32)
    # nn.Linear(1,1) init: U(-1, 1) (bound = 1/sqrt(fan_in) with fan_in=1)
    fc_w = jax.random.uniform(k_w, (1,), minval=-1.0, maxval=1.0, dtype=jnp.float32)
    fc_b = jax.random.uniform(k_b, (1,), minval=-1.0, maxval=1.0, dtype=jnp.float32)

    user_ids = jax.random.randint(k_uid, (batch,), 0, len_users, dtype=jnp.int32)
    movie_ids = jax.random.randint(k_mid, (batch,), 0, len_movies, dtype=jnp.int32)
    x = jnp.stack([user_ids, movie_ids], axis=1)  # (B, 2) int32

    ref = _reference(x, u_table, m_table, fc_w, fc_b)

    # Primary path: tables fit in VMEM -> in-kernel gather, no row DMAs.
    out_vmem = jax.block_until_ready(
        user_movie_embedding_forward(x, u_table, m_table, fc_w, fc_b))
    assert out_vmem.shape == (batch, 1)
    assert jnp.allclose(out_vmem, ref, atol=1e-5, rtol=1e-5)

    # Fallback path: force HBM-resident tables to exercise the DMA gather.
    out_hbm = jax.block_until_ready(
        user_movie_embedding_forward(x, u_table, m_table, fc_w, fc_b,
                                     force_hbm_tables=True))
    assert out_hbm.shape == (batch, 1)
    assert jnp.allclose(out_hbm, ref, atol=1e-5, rtol=1e-5)

    print("KERNEL_OK")
</pallas_src>

<mosaic_0001>
module attributes {stable_mosaic.version = 11 : i64} {
  func.func @_kernel_vmem_tables(%arg0: i32, %arg1: memref<8xi32, #tpu.memory_space<smem>>, %arg2: memref<8xi32, #tpu.memory_space<smem>>, %arg3: memref<64x32xf32, #tpu.memory_space<vmem>>, %arg4: memref<48x32xf32, #tpu.memory_space<vmem>>, %arg5: memref<1xf32, #tpu.memory_space<smem>>, %arg6: memref<1xf32, #tpu.memory_space<smem>>, %arg7: memref<1x1x8xf32, #tpu.memory_space<vmem>>, %arg8: memref<8x32xf32, #tpu.memory_space<vmem>>, %arg9: memref<8x32xf32, #tpu.memory_space<vmem>>) attributes {dimension_semantics = [#tpu.dimension_semantics<parallel>], iteration_bounds = array<i64: 1>, scalar_prefetch = 2 : i64, scratch_operands = 2 : i64, tpu.core_type = #tpu.core_type<tc>, window_params = [{pipeline_mode = #tpu.pipeline_mode<synchronous>, transform_indices = @transform_0, window_bounds = array<i64: 64, 32>}, {pipeline_mode = #tpu.pipeline_mode<synchronous>, transform_indices = @transform_1, window_bounds = array<i64: 48, 32>}, {transform_indices = @transform_2, window_bounds = array<i64: 1>}, {transform_indices = @transform_3, window_bounds = array<i64: 1>}, {transform_indices = @transform_4, window_bounds = array<i64: 1, 1, 8>}]} {
    %c8_i32 = arith.constant 8 : i32
    %0 = arith.muli %arg0, %c8_i32 : i32
    %c0 = arith.constant 0 : index
    %1 = memref.load %arg5[%c0] : memref<1xf32, #tpu.memory_space<smem>>
    %c0_0 = arith.constant 0 : index
    %2 = memref.load %arg6[%c0_0] : memref<1xf32, #tpu.memory_space<smem>>
    %c0_i32 = arith.constant 0 : i32
    %3 = arith.addi %0, %c0_i32 : i32
    %4 = arith.index_cast %3 : i32 to index
    %5 = memref.load %arg1[%4] : memref<8xi32, #tpu.memory_space<smem>>
    %6 = arith.addi %0, %c0_i32 : i32
    %7 = arith.index_cast %6 : i32 to index
    %8 = memref.load %arg2[%7] : memref<8xi32, #tpu.memory_space<smem>>
    %9 = arith.index_cast %5 : i32 to index
    %c0_1 = arith.constant 0 : index
    %10 = vector.load %arg3[%9, %c0_1] : memref<64x32xf32, #tpu.memory_space<vmem>>, vector<1x32xf32>
    %11 = arith.index_cast %c0_i32 : i32 to index
    %c0_2 = arith.constant 0 : index
    %12 = vector.load %arg8[%11, %c0_2] : memref<8x32xf32, #tpu.memory_space<vmem>>, vector<1x32xf32>
    tpu.vector_store %arg8[%11, %c0_2], %10 {strides = array<i32>} : memref<8x32xf32, #tpu.memory_space<vmem>>, vector<1x32xf32>,
    %13 = arith.index_cast %8 : i32 to index
    %c0_3 = arith.constant 0 : index
    %14 = vector.load %arg4[%13, %c0_3] : memref<48x32xf32, #tpu.memory_space<vmem>>, vector<1x32xf32>
    %15 = arith.index_cast %c0_i32 : i32 to index
    %c0_4 = arith.constant 0 : index
    %16 = vector.load %arg9[%15, %c0_4] : memref<8x32xf32, #tpu.memory_space<vmem>>, vector<1x32xf32>
    tpu.vector_store %arg9[%15, %c0_4], %14 {strides = array<i32>} : memref<8x32xf32, #tpu.memory_space<vmem>>, vector<1x32xf32>,
    %c1_i32 = arith.constant 1 : i32
    %17 = arith.addi %0, %c1_i32 : i32
    %18 = arith.index_cast %17 : i32 to index
    %19 = memref.load %arg1[%18] : memref<8xi32, #tpu.memory_space<smem>>
    %20 = arith.addi %0, %c1_i32 : i32
    %21 = arith.index_cast %20 : i32 to index
    %22 = memref.load %arg2[%21] : memref<8xi32, #tpu.memory_space<smem>>
    %23 = arith.index_cast %19 : i32 to index
    %c0_5 = arith.constant 0 : index
    %24 = vector.load %arg3[%23, %c0_5] : memref<64x32xf32, #tpu.memory_space<vmem>>, vector<1x32xf32>
    %25 = arith.index_cast %c1_i32 : i32 to index
    %c0_6 = arith.constant 0 : index
    %26 = vector.load %arg8[%25, %c0_6] : memref<8x32xf32, #tpu.memory_space<vmem>>, vector<1x32xf32>
    tpu.vector_store %arg8[%25, %c0_6], %24 {strides = array<i32>} : memref<8x32xf32, #tpu.memory_space<vmem>>, vector<1x32xf32>,
    %27 = arith.index_cast %22 : i32 to index
    %c0_7 = arith.constant 0 : index
    %28 = vector.load %arg4[%27, %c0_7] : memref<48x32xf32, #tpu.memory_space<vmem>>, vector<1x32xf32>
    %29 = arith.index_cast %c1_i32 : i32 to index
    %c0_8 = arith.constant 0 : index
    %30 = vector.load %arg9[%29, %c0_8] : memref<8x32xf32, #tpu.memory_space<vmem>>, vector<1x32xf32>
    tpu.vector_store %arg9[%29, %c0_8], %28 {strides = array<i32>} : memref<8x32xf32, #tpu.memory_space<vmem>>, vector<1x32xf32>,
    %c2_i32 = arith.constant 2 : i32
    %31 = arith.addi %0, %c2_i32 : i32
    %32 = arith.index_cast %31 : i32 to index
    %33 = memref.load %arg1[%32] : memref<8xi32, #tpu.memory_space<smem>>
    %34 = arith.addi %0, %c2_i32 : i32
    %35 = arith.index_cast %34 : i32 to index
    %36 = memref.load %arg2[%35] : memref<8xi32, #tpu.memory_space<smem>>
    %37 = arith.index_cast %33 : i32 to index
    %c0_9 = arith.constant 0 : index
    %38 = vector.load %arg3[%37, %c0_9] : memref<64x32xf32, #tpu.memory_space<vmem>>, vector<1x32xf32>
    %39 = arith.index_cast %c2_i32 : i32 to index
    %c0_10 = arith.constant 0 : index
    %40 = vector.load %arg8[%39, %c0_10] : memref<8x32xf32, #tpu.memory_space<vmem>>, vector<1x32xf32>
    tpu.vector_store %arg8[%39, %c0_10], %38 {strides = array<i32>} : memref<8x32xf32, #tpu.memory_space<vmem>>, vector<1x32xf32>,
    %41 = arith.index_cast %36 : i32 to index
    %c0_11 = arith.constant 0 : index
    %42 = vector.load %arg4[%41, %c0_11] : memref<48x32xf32, #tpu.memory_space<vmem>>, vector<1x32xf32>
    %43 = arith.index_cast %c2_i32 : i32 to index
    %c0_12 = arith.constant 0 : index
    %44 = vector.load %arg9[%43, %c0_12] : memref<8x32xf32, #tpu.memory_space<vmem>>, vector<1x32xf32>
    tpu.vector_store %arg9[%43, %c0_12], %42 {strides = array<i32>} : memref<8x32xf32, #tpu.memory_space<vmem>>, vector<1x32xf32>,
    %c3_i32 = arith.constant 3 : i32
    %45 = arith.addi %0, %c3_i32 : i32
    %46 = arith.index_cast %45 : i32 to index
    %47 = memref.load %arg1[%46] : memref<8xi32, #tpu.memory_space<smem>>
    %48 = arith.addi %0, %c3_i32 : i32
    %49 = arith.index_cast %48 : i32 to index
    %50 = memref.load %arg2[%49] : memref<8xi32, #tpu.memory_space<smem>>
    %51 = arith.index_cast %47 : i32 to index
    %c0_13 = arith.constant 0 : index
    %52 = vector.load %arg3[%51, %c0_13] : memref<64x32xf32, #tpu.memory_space<vmem>>, vector<1x32xf32>
    %53 = arith.index_cast %c3_i32 : i32 to index
    %c0_14 = arith.constant 0 : index
    %54 = vector.load %arg8[%53, %c0_14] : memref<8x32xf32, #tpu.memory_space<vmem>>, vector<1x32xf32>
    tpu.vector_store %arg8[%53, %c0_14], %52 {strides = array<i32>} : memref<8x32xf32, #tpu.memory_space<vmem>>, vector<1x32xf32>,
    %55 = arith.index_cast %50 : i32 to index
    %c0_15 = arith.constant 0 : index
    %56 = vector.load %arg4[%55, %c0_15] : memref<48x32xf32, #tpu.memory_space<vmem>>, vector<1x32xf32>
    %57 = arith.index_cast %c3_i32 : i32 to index
    %c0_16 = arith.constant 0 : index
    %58 = vector.load %arg9[%57, %c0_16] : memref<8x32xf32, #tpu.memory_space<vmem>>, vector<1x32xf32>
    tpu.vector_store %arg9[%57, %c0_16], %56 {strides = array<i32>} : memref<8x32xf32, #tpu.memory_space<vmem>>, vector<1x32xf32>,
    %c4_i32 = arith.constant 4 : i32
    %59 = arith.addi %0, %c4_i32 : i32
    %60 = arith.index_cast %59 : i32 to index
    %61 = memref.load %arg1[%60] : memref<8xi32, #tpu.memory_space<smem>>
    %62 = arith.addi %0, %c4_i32 : i32
    %63 = arith.index_cast %62 : i32 to index
    %64 = memref.load %arg2[%63] : memref<8xi32, #tpu.memory_space<smem>>
    %65 = arith.index_cast %61 : i32 to index
    %c0_17 = arith.constant 0 : index
    %66 = vector.load %arg3[%65, %c0_17] : memref<64x32xf32, #tpu.memory_space<vmem>>, vector<1x32xf32>
    %67 = arith.index_cast %c4_i32 : i32 to index
    %c0_18 = arith.constant 0 : index
    %68 = vector.load %arg8[%67, %c0_18] : memref<8x32xf32, #tpu.memory_space<vmem>>, vector<1x32xf32>
    tpu.vector_store %arg8[%67, %c0_18], %66 {strides = array<i32>} : memref<8x32xf32, #tpu.memory_space<vmem>>, vector<1x32xf32>,
    %69 = arith.index_cast %64 : i32 to index
    %c0_19 = arith.constant 0 : index
    %70 = vector.load %arg4[%69, %c0_19] : memref<48x32xf32, #tpu.memory_space<vmem>>, vector<1x32xf32>
    %71 = arith.index_cast %c4_i32 : i32 to index
    %c0_20 = arith.constant 0 : index
    %72 = vector.load %arg9[%71, %c0_20] : memref<8x32xf32, #tpu.memory_space<vmem>>, vector<1x32xf32>
    tpu.vector_store %arg9[%71, %c0_20], %70 {strides = array<i32>} : memref<8x32xf32, #tpu.memory_space<vmem>>, vector<1x32xf32>,
    %c5_i32 = arith.constant 5 : i32
    %73 = arith.addi %0, %c5_i32 : i32
    %74 = arith.index_cast %73 : i32 to index
    %75 = memref.load %arg1[%74] : memref<8xi32, #tpu.memory_space<smem>>
    %76 = arith.addi %0, %c5_i32 : i32
    %77 = arith.index_cast %76 : i32 to index
    %78 = memref.load %arg2[%77] : memref<8xi32, #tpu.memory_space<smem>>
    %79 = arith.index_cast %75 : i32 to index
    %c0_21 = arith.constant 0 : index
    %80 = vector.load %arg3[%79, %c0_21] : memref<64x32xf32, #tpu.memory_space<vmem>>, vector<1x32xf32>
    %81 = arith.index_cast %c5_i32 : i32 to index
    %c0_22 = arith.constant 0 : index
    %82 = vector.load %arg8[%81, %c0_22] : memref<8x32xf32, #tpu.memory_space<vmem>>, vector<1x32xf32>
    tpu.vector_store %arg8[%81, %c0_22], %80 {strides = array<i32>} : memref<8x32xf32, #tpu.memory_space<vmem>>, vector<1x32xf32>,
    %83 = arith.index_cast %78 : i32 to index
    %c0_23 = arith.constant 0 : index
    %84 = vector.load %arg4[%83, %c0_23] : memref<48x32xf32, #tpu.memory_space<vmem>>, vector<1x32xf32>
    %85 = arith.index_cast %c5_i32 : i32 to index
    %c0_24 = arith.constant 0 : index
    %86 = vector.load %arg9[%85, %c0_24] : memref<8x32xf32, #tpu.memory_space<vmem>>, vector<1x32xf32>
    tpu.vector_store %arg9[%85, %c0_24], %84 {strides = array<i32>} : memref<8x32xf32, #tpu.memory_space<vmem>>, vector<1x32xf32>,
    %c6_i32 = arith.constant 6 : i32
    %87 = arith.addi %0, %c6_i32 : i32
    %88 = arith.index_cast %87 : i32 to index
    %89 = memref.load %arg1[%88] : memref<8xi32, #tpu.memory_space<smem>>
    %90 = arith.addi %0, %c6_i32 : i32
    %91 = arith.index_cast %90 : i32 to index
    %92 = memref.load %arg2[%91] : memref<8xi32, #tpu.memory_space<smem>>
    %93 = arith.index_cast %89 : i32 to index
    %c0_25 = arith.constant 0 : index
    %94 = vector.load %arg3[%93, %c0_25] : memref<64x32xf32, #tpu.memory_space<vmem>>, vector<1x32xf32>
    %95 = arith.index_cast %c6_i32 : i32 to index
    %c0_26 = arith.constant 0 : index
    %96 = vector.load %arg8[%95, %c0_26] : memref<8x32xf32, #tpu.memory_space<vmem>>, vector<1x32xf32>
    tpu.vector_store %arg8[%95, %c0_26], %94 {strides = array<i32>} : memref<8x32xf32, #tpu.memory_space<vmem>>, vector<1x32xf32>,
    %97 = arith.index_cast %92 : i32 to index
    %c0_27 = arith.constant 0 : index
    %98 = vector.load %arg4[%97, %c0_27] : memref<48x32xf32, #tpu.memory_space<vmem>>, vector<1x32xf32>
    %99 = arith.index_cast %c6_i32 : i32 to index
    %c0_28 = arith.constant 0 : index
    %100 = vector.load %arg9[%99, %c0_28] : memref<8x32xf32, #tpu.memory_space<vmem>>, vector<1x32xf32>
    tpu.vector_store %arg9[%99, %c0_28], %98 {strides = array<i32>} : memref<8x32xf32, #tpu.memory_space<vmem>>, vector<1x32xf32>,
    %c7_i32 = arith.constant 7 : i32
    %101 = arith.addi %0, %c7_i32 : i32
    %102 = arith.index_cast %101 : i32 to index
    %103 = memref.load %arg1[%102] : memref<8xi32, #tpu.memory_space<smem>>
    %104 = arith.addi %0, %c7_i32 : i32
    %105 = arith.index_cast %104 : i32 to index
    %106 = memref.load %arg2[%105] : memref<8xi32, #tpu.memory_space<smem>>
    %107 = arith.index_cast %103 : i32 to index
    %c0_29 = arith.constant 0 : index
    %108 = vector.load %arg3[%107, %c0_29] : memref<64x32xf32, #tpu.memory_space<vmem>>, vector<1x32xf32>
    %109 = arith.index_cast %c7_i32 : i32 to index
    %c0_30 = arith.constant 0 : index
    %110 = vector.load %arg8[%109, %c0_30] : memref<8x32xf32, #tpu.memory_space<vmem>>, vector<1x32xf32>
    tpu.vector_store %arg8[%109, %c0_30], %108 {strides = array<i32>} : memref<8x32xf32, #tpu.memory_space<vmem>>, vector<1x32xf32>,
    %111 = arith.index_cast %106 : i32 to index
    %c0_31 = arith.constant 0 : index
    %112 = vector.load %arg4[%111, %c0_31] : memref<48x32xf32, #tpu.memory_space<vmem>>, vector<1x32xf32>
    %113 = arith.index_cast %c7_i32 : i32 to index
    %c0_32 = arith.constant 0 : index
    %114 = vector.load %arg9[%113, %c0_32] : memref<8x32xf32, #tpu.memory_space<vmem>>, vector<1x32xf32>
    tpu.vector_store %arg9[%113, %c0_32], %112 {strides = array<i32>} : memref<8x32xf32, #tpu.memory_space<vmem>>, vector<1x32xf32>,
    %c8_i32_33 = arith.constant 8 : i32
    %c0_34 = arith.constant 0 : index
    %c0_35 = arith.constant 0 : index
    %115 = vector.load %arg8[%c0_34, %c0_35] : memref<8x32xf32, #tpu.memory_space<vmem>>, vector<8x32xf32>
    %c0_36 = arith.constant 0 : index
    %c0_37 = arith.constant 0 : index
    %116 = vector.load %arg9[%c0_36, %c0_37] : memref<8x32xf32, #tpu.memory_space<vmem>>, vector<8x32xf32>
    %117 = arith.mulf %115, %116 : vector<8x32xf32>
    %cst = arith.constant dense<0.000000e+00> : vector<8xf32>
    %118 = vector.multi_reduction <add>, %117, %cst [1] : vector<8x32xf32> to vector<8xf32>
    %119 = vector.broadcast %1 : f32 to vector<8xf32>
    %120 = arith.mulf %118, %119 : vector<8xf32>
    %121 = vector.broadcast %2 : f32 to vector<8xf32>
    %122 = arith.addf %120, %121 : vector<8xf32>
    %123 = arith.negf %122 : vector<8xf32>
    %124 = math.exp %123 : vector<8xf32>
    %cst_38 = arith.constant 1.000000e+00 : f32
    %125 = vector.broadcast %cst_38 : f32 to vector<8xf32>
    %126 = arith.addf %125, %124 : vector<8xf32>
    %127 = arith.divf %125, %126 : vector<8xf32>
    %128 = vector.shape_cast %127 : vector<8xf32> to vector<1x1x8xf32>
    %c0_39 = arith.constant 0 : index
    %c0_40 = arith.constant 0 : index
    %c0_41 = arith.constant 0 : index
    %129 = vector.load %arg7[%c0_39, %c0_40, %c0_41] : memref<1x1x8xf32, #tpu.memory_space<vmem>>, vector<1x1x8xf32>
    tpu.vector_store %arg7[%c0_39, %c0_40, %c0_41], %128 {strides = array<i32>} : memref<1x1x8xf32, #tpu.memory_space<vmem>>, vector<1x1x8xf32>,
    return
  }
  func.func @transform_0(%arg0: i32, %arg1: memref<8xi32, #tpu.memory_space<smem>>, %arg2: memref<8xi32, #tpu.memory_space<smem>>) -> (i32, i32) {
    %c0_i32 = arith.constant 0 : i32
    %c0_i32_0 = arith.constant 0 : i32
    %c0_i32_1 = arith.constant 0 : i32
    return %c0_i32, %c0_i32_0 : i32, i32
  }
  func.func @transform_1(%arg0: i32, %arg1: memref<8xi32, #tpu.memory_space<smem>>, %arg2: memref<8xi32, #tpu.memory_space<smem>>) -> (i32, i32) {
    %c0_i32 = arith.constant 0 : i32
    %c0_i32_0 = arith.constant 0 : i32
    %c0_i32_1 = arith.constant 0 : i32
    return %c0_i32, %c0_i32_0 : i32, i32
  }
  func.func @transform_2(%arg0: i32, %arg1: memref<8xi32, #tpu.memory_space<smem>>, %arg2: memref<8xi32, #tpu.memory_space<smem>>) -> i32 {
    %c0_i32 = arith.constant 0 : i32
    %c0_i32_0 = arith.constant 0 : i32
    return %c0_i32 : i32
  }
  func.func @transform_3(%arg0: i32, %arg1: memref<8xi32, #tpu.memory_space<smem>>, %arg2: memref<8xi32, #tpu.memory_space<smem>>) -> i32 {
    %c0_i32 = arith.constant 0 : i32
    %c0_i32_0 = arith.constant 0 : i32
    return %c0_i32 : i32
  }
  func.func @transform_4(%arg0: i32, %arg1: memref<8xi32, #tpu.memory_space<smem>>, %arg2: memref<8xi32, #tpu.memory_space<smem>>) -> (i32, i32, i32) {
    %c0_i32 = arith.constant 0 : i32
    %c0_i32_0 = arith.constant 0 : i32
    %c0_i32_1 = arith.constant 0 : i32
    return %arg0, %c0_i32, %c0_i32_0 : i32, i32, i32
  }
}

</mosaic_0001>

<bundles_post_ra>
// kernel: tpu_custom_call.1
= control target key start
LH: loop header
LB: loop body
LE: loop exit
PB: predicated region body
PF: predicated region fallthrough
CT: control target
= control target key end

     0   :  { %s374_s0 = inlined_call_operand.vmem [shape: s32[8], index: 0, kind: input, shape index: {}]   ;;  %s375_s2 = inlined_call_operand.vmem [shape: f32[64,32], index: 2, kind: input, shape index: {}]   ;;  %s376_s3 = inlined_call_operand.vmem [shape: f32[48,32], index: 3, kind: input, shape index: {}]   ;;  %s377_s4 = inlined_call_operand.<no memory space> [shape: f32[1], index: 4, kind: input, shape index: {}]   ;;  %s378_s5 = inlined_call_operand.<no memory space> [shape: f32[1], index: 5, kind: input, shape index: {}]   ;;  %s379_s6 = inlined_call_operand.hbm [shape: f32[1,1,8], index: 6, kind: output, shape index: {}]   ;;  %s380_s1 = inlined_call_operand.vmem [shape: s32[8], index: 1, kind: input, shape index: {}]  }
   0x1   :  { %s11_s23 = sshll.u32 %s374_s0, 4  ;;  %s15_s26 = sshll.u32 %s380_s1, 4  ;;  %s12_s23 = int_to_ptr.vmem [resolvable:$true] %s11_s23  ;;  %s16_s26 = int_to_ptr.vmem [resolvable:$true] %s15_s26 }
   0x2   :  { %s186_s27 = scalar_lea.vmem %s12_s23, 16  ;;  %p191_p1 = scmp.lt.s32.totalorder %s12_s23, %s12_s23 }
   0x3   :  { %p187_p0 = scmp.ne.s32.totalorder %s12_s23, %s186_s27  ;;  %p192_p2 = scmp.lt.s32.totalorder %s186_s27, %s186_s27 }
   0x5   :  { %p193_p3 = por %p192_p2, %p191_p1 }
   0x7   :  { %p194_p4 = pnand %p193_p3, %p187_p0 }
   0x9   :  { %197 = shalt.err (!%p194_p4)  }
   0xa   :  { %s236_s28 = smov [#allocation5]   ;;  %s198_s29 = scalar_lea.vmem %s16_s26, 16 }
   0xb   :  { %14 = dma.vmem_to_smem %s12_s23, 16, %s236_s28, [#allocation4] }
   0xc   :  { %p199_p5 = scmp.ne.s32.totalorder %s16_s26, %s198_s29  ;;  %p203_p6 = scmp.lt.s32.totalorder %s16_s26, %s16_s26 }
   0xd   :  { %p204_p7 = scmp.lt.s32.totalorder %s198_s29, %s198_s29 }
   0xf   :  { %p205_p8 = por %p204_p7, %p203_p6 }
  0x11   :  { %p206_p9 = pnand %p205_p8, %p199_p5 }
  0x13   :  { %209 = shalt.err (!%p206_p9)  }
  0x14   :  { %s237_s0 = smov [#allocation6]  }
  0x15   :  { %18 = dma.vmem_to_smem %s16_s26, 16, %s237_s0, [#allocation4] }
  0x16   :  { %232 = dma.done.wait [#allocation4], 32 }
  0x17   :  { %233 = vsyncadd [#allocation4], 4294967264 }
  0x18   :  { %22 = sfence }
  0x19   :  { %s35_s1 = sld [smem:[#allocation5]]  ;;  %s164_s7 = sld [smem:[#allocation5 + $0x1]] }
  0x1a   :  { %s36_s30 = sld [smem:[#allocation6]]  ;;  %s165_s8 = sld [smem:[#allocation6 + $0x1]] }
  0x1b   :  { %23 = vsyncpa [#allocation10], 0  ;;  %s166_s9 = sld [smem:[#allocation5 + $0x2]]  ;;  %s168_s11 = sld [smem:[#allocation5 + $0x3]]  ;;  %vm39_vm0 = vcmask 253952   ;;  %vm110_vm1 = vcmask 261120   ;;  %v114_v20 = vstv %s377_s4  ;;  %v116_v22 = vstv %s378_s5 }
  0x1c   :  { %s167_s10 = sld [smem:[#allocation6 + $0x2]]  ;;  %s169_s12 = sld [smem:[#allocation6 + $0x3]]  ;;  %v125_v28 = vlaneseq  ;;  %vm132_vm2 = vcmask 57344  }
  0x1d   :  { %s280_s13 = sld [smem:[#allocation5 + $0x4]]  ;;  %s284_s15 = sld [smem:[#allocation5 + $0x5]] }
  0x1e   :  { %s282_s14 = sld [smem:[#allocation6 + $0x4]]  ;;  %s286_s16 = sld [smem:[#allocation6 + $0x5]]  ;;  %v126_v29 = vand.u32 127, %v125_v28  ;;  %v128_v30 = vshrl.u32 %v125_v28, 7 }
  0x1f   :  { %s37_s19 = scalar_lea.vmem %s375_s2, %s35_s1  ;;  %s47_s25 = scalar_lea.vmem %s375_s2, %s164_s7 }
  0x20   :  { %s41_s22 = scalar_lea.vmem %s376_s3, %s36_s30  ;;  %v38_v0 = vld [vmem:[%s37_s19] sm:$0x1]  ;;  %s50_s28 = scalar_lea.vmem %s376_s3, %s165_s8  ;;  %v129_v31 = vsub.s32 %v126_v29, %v128_v30 }
  0x21   :  { %v42_v1 = vld [vmem:[%s41_s22] sm:$0x1]  ;;  %40 = vst.msk [vmem:[#allocation2] sm:$0x1] %vm39_vm0, %v38_v0  ;;  %s56_s1 = scalar_lea.vmem %s375_s2, %s166_s9  ;;  %s65_s19 = scalar_lea.vmem %s375_s2, %s168_s11 }
  0x22   :  { %43 = vst.msk [vmem:[#allocation3] sm:$0x1] %vm39_vm0, %v42_v1  ;;  %v48_v2 = vld [vmem:[%s47_s25] sm:$0x1]  ;;  %s59_s7 = scalar_lea.vmem %s376_s3, %s167_s10  ;;  %s68_s9 = scalar_lea.vmem %s376_s3, %s169_s12 }
  0x23   :  { %v51_v3 = vld [vmem:[%s50_s28] sm:$0x1]  ;;  %49 = vst.msk [vmem:[#allocation2 + $0x1] sm:$0x1] %vm39_vm0, %v48_v2  ;;  %s74_s23 = scalar_lea.vmem %s375_s2, %s280_s13  ;;  %s83_s27 = scalar_lea.vmem %s375_s2, %s284_s15 }
  0x24   :  { %52 = vst.msk [vmem:[#allocation3 + $0x1] sm:$0x1] %vm39_vm0, %v51_v3  ;;  %v57_v4 = vld [vmem:[%s56_s1] sm:$0x1]  ;;  %s77_s26 = scalar_lea.vmem %s376_s3, %s282_s14  ;;  %s86_s0 = scalar_lea.vmem %s376_s3, %s286_s16 }
  0x25   :  { %v60_v5 = vld [vmem:[%s59_s7] sm:$0x1]  ;;  %58 = vst.msk [vmem:[#allocation2 + $0x2] sm:$0x1] %vm39_vm0, %v57_v4  ;;  %s174_s13 = sld [smem:[#allocation5 + $0x6]]  ;;  %s176_s1 = sld [smem:[#allocation5 + $0x7]] }
  0x26   :  { %61 = vst.msk [vmem:[#allocation3 + $0x2] sm:$0x1] %vm39_vm0, %v60_v5  ;;  %v66_v6 = vld [vmem:[%s65_s19] sm:$0x1]  ;;  %s175_s14 = sld [smem:[#allocation6 + $0x6]]  ;;  %s177_s30 = sld [smem:[#allocation6 + $0x7]] }
  0x27   :  { %v69_v7 = vld [vmem:[%s68_s9] sm:$0x1]  ;;  %67 = vst.msk [vmem:[#allocation2 + $0x3] sm:$0x1] %vm39_vm0, %v66_v6  ;;  %s238_s25 = smov [#allocation9]  }
  0x28   :  { %70 = vst.msk [vmem:[#allocation3 + $0x3] sm:$0x1] %vm39_vm0, %v69_v7  ;;  %v75_v8 = vld [vmem:[%s74_s23] sm:$0x1] }
  0x29   :  { %v78_v9 = vld [vmem:[%s77_s26] sm:$0x1]  ;;  %76 = vst.msk [vmem:[#allocation2 + $0x4] sm:$0x1] %vm39_vm0, %v75_v8  ;;  %s140_s26 = sshll.u32 %s238_s25, 4  ;;  %s141_s26 = int_to_ptr.vmem [resolvable:$true] %s140_s26 }
  0x2a   :  { %79 = vst.msk [vmem:[#allocation3 + $0x4] sm:$0x1] %vm39_vm0, %v78_v9  ;;  %v84_v10 = vld [vmem:[%s83_s27] sm:$0x1]  ;;  %s210_s4 = scalar_lea.vmem %s141_s26, 16  ;;  %s214_s5 = scalar_lea.vmem %s141_s26, 32 }
  0x2b   :  { %v87_v11 = vld [vmem:[%s86_s0] sm:$0x1]  ;;  %85 = vst.msk [vmem:[#allocation2 + $0x5] sm:$0x1] %vm39_vm0, %v84_v10  ;;  %s92_s7 = scalar_lea.vmem %s375_s2, %s174_s13  ;;  %s101_s21 = scalar_lea.vmem %s375_s2, %s176_s1 }
  0x2c   :  { %88 = vst.msk [vmem:[#allocation3 + $0x5] sm:$0x1] %vm39_vm0, %v87_v11  ;;  %v93_v12 = vld [vmem:[%s92_s7] sm:$0x1]  ;;  %s95_s18 = scalar_lea.vmem %s376_s3, %s175_s14  ;;  %s104_s22 = scalar_lea.vmem %s376_s3, %s177_s30 }
  0x2d   :  { %94 = vst.msk [vmem:[#allocation2 + $0x6] sm:$0x1] %vm39_vm0, %v93_v12  ;;  %v96_v13 = vld [vmem:[%s95_s18] sm:$0x1]  ;;  %p211_p10 = scmp.ne.s32.totalorder %s141_s26, %s210_s4  ;;  %p215_p11 = scmp.lt.s32.totalorder %s141_s26, %s141_s26 }
  0x2e   :  { %v102_v14 = vld [vmem:[%s101_s21] sm:$0x1]  ;;  %97 = vst.msk [vmem:[#allocation3 + $0x6] sm:$0x1] %vm39_vm0, %v96_v13  ;;  %p216_p12 = scmp.lt.s32.totalorder %s214_s5, %s210_s4 }
  0x2f   :  { %103 = vst.msk [vmem:[#allocation2 + $0x7] sm:$0x1] %vm39_vm0, %v102_v14  ;;  %v105_v15 = vld [vmem:[%s104_s22] sm:$0x1] }
  0x30   :  { %106 = vst.msk [vmem:[#allocation3 + $0x7] sm:$0x1] %vm39_vm0, %v105_v15  ;;  %p217_p13 = por %p216_p12, %p215_p11 }
  0x32   :  { %p218_p0 = pnand %p217_p13, %p211_p10 }
  0x36   :  { %v107_v16 = vld [vmem:[#allocation2] sm:$0xff] }
  0x37   :  { %v108_v17 = vld [vmem:[#allocation3] sm:$0xff] }
  0x38   :  { %v109_v18 = vmul.f32 %v108_v17, %v107_v16 }
  0x3a   :  { %v111_v19 = vsel %vm110_vm1, %v109_v18, 0.0 }
  0x3b   :  { %112 = vadd.xlane.f32.xlu0 %v111_v19 }
  0xc8   :  { %v113_v21 = vpop.xlane.xlu0 %112 }
  0xc9   :  { %v115_v23 = vmul.f32 %v114_v20, %v113_v21 }
  0xcb   :  { %v117_v24 = vadd.f32 %v116_v22, %v115_v23 }
  0xcd   :  { %v178_v25 = vmul.f32 -1.442695, %v117_v24 }
  0xcf   :  { %182 = vpow2.f32 %v178_v25 }
  0xd9   :  { %v183_v26 = vpop.eup %182 }
  0xda   :  { %v121_v27 = vadd.f32 1.0, %v183_v26 }
  0xdc   :  { %184 = vrcp.f32 %v121_v27 }
  0xe6   :  { %v185_v32 = vpop.eup %184 }
  0xe7   :  { %v130_v33 = vrot.slane %v185_v32, %v129_v31 }
  0xe9   :  { %133 = vst.msk [vmem:[#allocation9] sm:$0x1] %vm132_vm2, %v130_v33 }
  0xea   :  { %221 = shalt.err (!%p218_p0)
}
  0xeb   :  { %s222_s27 = scalar_lea.hbm %s379_s6, 16 }
  0xec   :  { %p223_p1 = scmp.ne.s32.totalorder %s379_s6, %s222_s27  ;;  %p226_p2 = scmp.lt.u32.totalorder %s222_s27, %s379_s6 }
  0xee   :  { %p228_p3 = pnand %p226_p2, %p223_p1 }
  0xf0   :  { %231 = shalt.err (!%p228_p3)
}
  0xf1   :  { %143 = dma.vmem_to_hbm [thread:$0]  %s141_s26, 16, %s379_s6, [#allocation10]  }
  0xf2   :  { %234 = dma.done.wait [#allocation10], 16  }
  0xf3   :  { %235 = vsyncadd [#allocation10], 4294967280 }
  0xf4   :  { %147 = vsyncpa [#allocation10], 1 }

</bundles_post_ra>
